<compile_context>
chip_gen: v5e
topology: v5e:2x2
jax: 0.10.0
libtpu: 0.0.40
codegen_flags: <defaults>
</compile_context>

<pallas_src>
import math

import jax
import jax.numpy as jnp
from jax.experimental import pallas as pl
from jax.experimental.pallas import tpu as pltpu

_VMEM_LIMIT = None


def _vmem_limit_bytes():
    """Generation-aware VMEM budget: ~3/4 of physical, capped at 96 MiB.
    v5e/v6e (128 MiB physical) -> 96 MiB; v7x (64 MiB physical) -> 48 MiB."""
    global _VMEM_LIMIT
    if _VMEM_LIMIT is None:
        cap = 64 * 1024 * 1024
        try:
            info = pltpu.get_tpu_info()
            cap = int(getattr(info, "vmem_capacity_bytes", cap) or cap)
        except Exception:
            pass
        _VMEM_LIMIT = int(min(cap * 3 // 4, 96 * 1024 * 1024))
    return _VMEM_LIMIT


def _round_up(x, m):
    return ((x + m - 1) // m) * m


def _pick(dim, prefs):
    """Largest preferred tile that divides `dim`; falls back to the full dim
    (host-side padding keeps the fallback from producing oversized tiles)."""
    for t in prefs:
        if dim % t == 0:
            return t
    return dim


# ---------------------------------------------------------------------------
# Fused (LayerNorm) + matmul + bias (+GELU) (+residual) kernel, bf16 I/O
# ---------------------------------------------------------------------------
def fused_matmul(x, w, b=None, *, gamma=None, beta=None, act=None,
                 residual=None, eps=1e-5, tm=None, tn=None):
    """out = [residual +] act( LN(x) @ w + b ), bf16 in/out, f32 accumulation.

    Grid (M/tm, N/tn), both 'parallel' (megacore split).  The contraction dim
    K is kept whole per tile (needed for the LayerNorm fusion and small enough
    at GPT-2 sizes), so there is no accumulator scratch and each output tile
    is computed + written in a single grid step.
    """
    M, K = x.shape
    K2, N = w.shape
    assert K == K2
    tm = tm or _pick(M, (1024, 512, 256, 128, 64, 32, 16, 8))
    tn = tn or _pick(N, (512, 256, 128))
    nm, nn = M // tm, N // tn
    has_b = b is not None
    has_ln = gamma is not None
    has_res = residual is not None

    def kernel(*refs):
        idx = 0
        x_ref = refs[idx]; idx += 1
        w_ref = refs[idx]; idx += 1
        b_ref = g_ref = be_ref = r_ref = None
        if has_b:
            b_ref = refs[idx]; idx += 1
        if has_ln:
            g_ref, be_ref = refs[idx], refs[idx + 1]; idx += 2
        if has_res:
            r_ref = refs[idx]; idx += 1
        o_ref = refs[idx]

        xv = x_ref[...]
        if has_ln:                           # LN statistics in f32 (v5e-safe)
            xf = xv.astype(jnp.float32)
            mu = jnp.mean(xf, axis=-1, keepdims=True)
            var = jnp.mean(jnp.square(xf - mu), axis=-1, keepdims=True)
            xv = ((xf - mu) * jax.lax.rsqrt(var + eps) * g_ref[...]
                  + be_ref[...]).astype(jnp.bfloat16)
        else:
            xv = xv.astype(jnp.bfloat16)     # no-op: activations already bf16
        y = jnp.dot(xv, w_ref[...], preferred_element_type=jnp.float32)
        if has_b:
            y = y + b_ref[...]
        if act == "gelu":
            y = jax.nn.gelu(y, approximate=True)        # GPT-2 "gelu_new"
        if has_res:
            y = y + r_ref[...].astype(jnp.float32)       # fused residual add
        o_ref[...] = y.astype(o_ref.dtype)

    in_specs = [pl.BlockSpec((tm, K), lambda i, j: (i, 0)),
                pl.BlockSpec((K, tn), lambda i, j: (0, j))]
    args = [x, w]
    if has_b:
        in_specs.append(pl.BlockSpec((1, tn), lambda i, j: (0, j)))
        args.append(b.reshape(1, N).astype(jnp.float32))
    if has_ln:
        in_specs.append(pl.BlockSpec((1, K), lambda i, j: (0, 0)))
        in_specs.append(pl.BlockSpec((1, K), lambda i, j: (0, 0)))
        args.append(gamma.reshape(1, K).astype(jnp.float32))
        args.append(beta.reshape(1, K).astype(jnp.float32))
    if has_res:
        in_specs.append(pl.BlockSpec((tm, tn), lambda i, j: (i, j)))
        args.append(residual)

    return pl.pallas_call(
        kernel,
        out_shape=jax.ShapeDtypeStruct((M, N), jnp.bfloat16),
        grid=(nm, nn),
        in_specs=in_specs,
        out_specs=pl.BlockSpec((tm, tn), lambda i, j: (i, j)),
        compiler_params=pltpu.CompilerParams(
            dimension_semantics=("parallel", "parallel"),
            vmem_limit_bytes=_vmem_limit_bytes()),
    )(*args)


# ---------------------------------------------------------------------------
# Flash-style causal self-attention (online softmax, causal block skipping)
# ---------------------------------------------------------------------------
def flash_attention(qkv, lengths, tq=None, tkv=None):
    """qkv: (B, T, 3, H, hd) bf16 (a free view of the QKV matmul output whose
    columns are laid out (which, head, dim)); lengths: (B,) int32 valid lengths
    (prefix padding mask).  Returns (B, T, H, hd) bf16 which reshapes for free
    into the (B*T, D) token-major layout the projection matmul expects.

    Fully-masked (above-diagonal / fully-padded) KV blocks are skipped via
    pl.when; strictly-interior blocks take an unmasked fast path with no
    per-element compare/select work."""
    B, T, three, H, hd = qkv.shape
    assert three == 3
    tq = tq or _pick(T, (512, 256, 128, 64, 32, 16, 8))
    tkv = tkv or tq
    nq, nkv = T // tq, T // tkv
    scale = 1.0 / math.sqrt(hd)

    def kernel(len_ref, q_ref, k_ref, v_ref, o_ref, m_ref, l_ref, acc_ref):
        b, qi, ki = pl.program_id(0), pl.program_id(1), pl.program_id(2)

        @pl.when(ki == 0)
        def _():
            m_ref[...] = jnp.full_like(m_ref, -1e30)
            l_ref[...] = jnp.zeros_like(l_ref)
            acc_ref[...] = jnp.zeros_like(acc_ref)

        seq_len = len_ref[b]                              # SMEM scalar
        q_start = qi * tq
        k_start = ki * tkv
        # any (row, col) in this block with col <= row and col < seq_len ?
        block_needed = (k_start <= q_start + (tq - 1)) & (k_start < seq_len)

        def run_heads(masked):
            # Static unroll over heads: plain 2-D MXU matmuls with per-head
            # online softmax state in VMEM scratch.
            if masked:
                row = q_start + jax.lax.broadcasted_iota(jnp.int32, (tq, tkv), 0)
                col = k_start + jax.lax.broadcasted_iota(jnp.int32, (tq, tkv), 1)
                keep = (col <= row) & (col < seq_len)     # causal & padding
            for h in range(H):
                # QK^T via transposed contraction -- no in-kernel k.T relayout.
                s = jax.lax.dot_general(
                    q_ref[:, h, :], k_ref[:, h, :],
                    (((1,), (1,)), ((), ())),
                    preferred_element_type=jnp.float32) * scale
                if masked:
                    s = jnp.where(keep, s, -1e30)
                m_old = m_ref[h]                          # (tq, 1) f32
                m_new = jnp.maximum(m_old, jnp.max(s, axis=-1, keepdims=True))
                p = jnp.exp(s - m_new)                    # f32 softmax math
                if masked:
                    p = jnp.where(keep, p, 0.0)           # fully-masked rows
                alpha = jnp.exp(m_old - m_new)
                l_ref[h] = alpha * l_ref[h] + jnp.sum(p, axis=-1, keepdims=True)
                acc_ref[h] = alpha * acc_ref[h] + jnp.dot(
                    p.astype(jnp.bfloat16), v_ref[:, h, :],
                    preferred_element_type=jnp.float32)
                m_ref[h] = m_new

        @pl.when(block_needed)
        def _():
            # Strictly interior: every (row, col) is visible -> no mask work.
            interior = (k_start + (tkv - 1) <= q_start) & (k_start + tkv <= seq_len)

            @pl.when(interior)
            def _():
                run_heads(False)

            @pl.when(jnp.logical_not(interior))
            def _():
                run_heads(True)

        @pl.when(ki == pl.num_programs(2) - 1)
        def _():
            for h in range(H):
                l = l_ref[h]
                inv = jnp.where(l > 0.0, pl.reciprocal(l, approx=True), 0.0)
                o_ref[:, h, :] = (acc_ref[h] * inv).astype(o_ref.dtype)

    qspec = pl.BlockSpec((None, tq, None, H, hd),
                         lambda b, qi, ki, lens: (b, qi, 0, 0, 0))
    kspec = pl.BlockSpec((None, tkv, None, H, hd),
                         lambda b, qi, ki, lens: (b, ki, 1, 0, 0))
    vspec = pl.BlockSpec((None, tkv, None, H, hd),
                         lambda b, qi, ki, lens: (b, ki, 2, 0, 0))
    ospec = pl.BlockSpec((None, tq, H, hd),
                         lambda b, qi, ki, lens: (b, qi, 0, 0))

    grid_spec = pltpu.PrefetchScalarGridSpec(
        num_scalar_prefetch=1,
        grid=(B, nq, nkv),
        in_specs=[qspec, kspec, vspec],
        out_specs=ospec,
        scratch_shapes=[pltpu.VMEM((H, tq, 1), jnp.float32),   # running max
                        pltpu.VMEM((H, tq, 1), jnp.float32),   # running denom
                        pltpu.VMEM((H, tq, hd), jnp.float32)]) # output accum

    return pl.pallas_call(
        kernel,
        out_shape=jax.ShapeDtypeStruct((B, T, H, hd), jnp.bfloat16),
        grid_spec=grid_spec,
        compiler_params=pltpu.CompilerParams(
            dimension_semantics=("parallel", "parallel", "arbitrary"),
            vmem_limit_bytes=_vmem_limit_bytes()),
    )(lengths, qkv, qkv, qkv)


# ---------------------------------------------------------------------------
# Fused final LayerNorm + tied LM head + shifted cross-entropy
# ---------------------------------------------------------------------------
def lm_head_ce(x, wte, lnf_g, lnf_b, labels, weights, v_real,
               eps=1e-5, tm=None, tv=None):
    """Per-position weighted CE (reduction='none', ignore_index=-100).

    Logits are produced one (tm, tv) tile at a time with an online logsumexp
    + label-pick accumulator in VMEM scratch, so the full (B*T, V) logits
    tensor never touches HBM and wte (V_pad, D) is consumed as-is (contract
    over D).  The LayerNorm'd bf16 hidden tile is computed once per row block
    (at v == 0) into a VMEM scratch and reused across the vocab loop.  Vocab
    columns >= v_real (padding rows of wte) are masked to -inf.
    Returns (B*T,) f32: 0 where label == -100, otherwise CE * weight.
    """
    M, D = x.shape
    Vp, D2 = wte.shape
    assert D == D2
    tm = tm or _pick(M, (512, 256, 128, 64, 32, 16, 8))
    tv = tv or _pick(Vp, (1024, 512, 256, 128))
    nm, nv = M // tm, Vp // tv
    mask_cols = Vp != v_real                     # static: padded vocab columns

    def kernel(x_ref, g_ref, be_ref, w_ref, lbl_ref, wgt_ref, o_ref,
               h_ref, m_ref, l_ref, p_ref):
        v = pl.program_id(1)

        @pl.when(v == 0)
        def _():
            # final LayerNorm computed once per row block, stored bf16
            xv = x_ref[...].astype(jnp.float32)
            mu = jnp.mean(xv, axis=-1, keepdims=True)
            var = jnp.mean(jnp.square(xv - mu), axis=-1, keepdims=True)
            h_ref[...] = ((xv - mu) * jax.lax.rsqrt(var + eps) * g_ref[...]
                          + be_ref[...]).astype(jnp.bfloat16)
            m_ref[...] = jnp.full_like(m_ref, -1e30)
            l_ref[...] = jnp.zeros_like(l_ref)
            p_ref[...] = jnp.zeros_like(p_ref)

        z = jax.lax.dot_general(h_ref[...], w_ref[...],
                                (((1,), (1,)), ((), ())),
                                preferred_element_type=jnp.float32)   # (tm, tv)
        col = v * tv + jax.lax.broadcasted_iota(jnp.int32, z.shape, 1)
        if mask_cols:
            z = jnp.where(col < v_real, z, -1e30)          # mask padded vocab

        lbl = lbl_ref[...]                                 # (tm, 1)
        m_old = m_ref[...]
        m_new = jnp.maximum(m_old, jnp.max(z, axis=-1, keepdims=True))
        l_ref[...] = l_ref[...] * jnp.exp(m_old - m_new) + \
            jnp.sum(jnp.exp(z - m_new), axis=-1, keepdims=True)
        m_ref[...] = m_new
        p_ref[...] += jnp.sum(jnp.where(col == lbl, z, 0.0),
                              axis=-1, keepdims=True)

        @pl.when(v == nv - 1)
        def _():
            lse = m_ref[...] + jnp.log(l_ref[...])
            loss = jnp.where(lbl != -100, lse - p_ref[...], 0.0)
            o_ref[...] = loss * wgt_ref[...]

    out = pl.pallas_call(
        kernel,
        out_shape=jax.ShapeDtypeStruct((M, 1), jnp.float32),
        grid=(nm, nv),
        in_specs=[pl.BlockSpec((tm, D), lambda i, v: (i, 0)),
                  pl.BlockSpec((1, D), lambda i, v: (0, 0)),
                  pl.BlockSpec((1, D), lambda i, v: (0, 0)),
                  pl.BlockSpec((tv, D), lambda i, v: (v, 0)),
                  pl.BlockSpec((tm, 1), lambda i, v: (i, 0)),
                  pl.BlockSpec((tm, 1), lambda i, v: (i, 0))],
        out_specs=pl.BlockSpec((tm, 1), lambda i, v: (i, 0)),
        scratch_shapes=[pltpu.VMEM((tm, D), jnp.bfloat16),   # LN'd hidden
                        pltpu.VMEM((tm, 1), jnp.float32),    # running max
                        pltpu.VMEM((tm, 1), jnp.float32),    # running denom
                        pltpu.VMEM((tm, 1), jnp.float32)],   # picked logit
        compiler_params=pltpu.CompilerParams(
            dimension_semantics=("parallel", "arbitrary"),
            vmem_limit_bytes=_vmem_limit_bytes()),
    )(x, lnf_g.reshape(1, D).astype(jnp.float32),
      lnf_b.reshape(1, D).astype(jnp.float32),
      wte,
      labels.reshape(M, 1).astype(jnp.int32),
      weights.reshape(M, 1).astype(jnp.float32))
    return out.reshape(-1)


# ---------------------------------------------------------------------------
# Synthetic GPT-2 "encdec" built on the kernels above
# ---------------------------------------------------------------------------
def init_params(key, cfg):
    Vr, D, L, P, F = (cfg["vocab"], cfg["d_model"], cfg["n_layer"],
                      cfg["max_pos"], cfg["d_ff"])
    Vp = _round_up(Vr, 128)          # lane-aligned vocab (padded rows masked)
    keys = iter(jax.random.split(key, 2 + 4 * L))

    def nrm(shape, dtype=jnp.bfloat16):
        # MXU weights are stored bf16 in HBM; biases / LN params / positional
        # table stay f32.
        return (0.02 * jax.random.normal(next(keys), shape)).astype(dtype)

    params = {
        "wte": nrm((Vp, D)),                           # tied embedding / LM head
        "wpe": nrm((P, D), jnp.float32),
        "lnf_g": jnp.ones((D,), jnp.float32),
        "lnf_b": jnp.zeros((D,), jnp.float32),
        "blocks": [],
    }
    for _ in range(L):
        params["blocks"].append(dict(
            ln1_g=jnp.ones((D,), jnp.float32), ln1_b=jnp.zeros((D,), jnp.float32),
            # w_qkv columns are laid out (3, H, hd) so the QKV matmul output
            # reshapes for free to (B, T, 3, H, hd) -- no host transposes.
            w_qkv=nrm((D, 3 * D)), b_qkv=jnp.zeros((3 * D,), jnp.float32),
            w_proj=nrm((D, D)), b_proj=jnp.zeros((D,), jnp.float32),
            ln2_g=jnp.ones((D,), jnp.float32), ln2_b=jnp.zeros((D,), jnp.float32),
            w_fc=nrm((D, F)), b_fc=jnp.zeros((F,), jnp.float32),
            w_out=nrm((F, D)), b_out=jnp.zeros((D,), jnp.float32),
        ))
    return params


def gpt2_forward_loss(params, ids, attn_mask, labels, loss_w, cfg):
    """GPT-2 forward; returns per-position weighted CE loss, shape (B*T,)."""
    B, T = ids.shape
    D, H = cfg["d_model"], cfg["n_head"]
    hd = D // H

    # embedding gathers are glue; residual stream lives in bf16 HBM
    x = (params["wte"][ids].astype(jnp.float32)
         + params["wpe"][:T][None, :, :]).astype(jnp.bfloat16)
    x = x.reshape(B * T, D)
    lengths = jnp.sum(attn_mask, axis=1).astype(jnp.int32)   # prefix padding mask

    for blk in params["blocks"]:
        # LN1 fused into the QKV matmul
        qkv = fused_matmul(x, blk["w_qkv"], blk["b_qkv"],
                           gamma=blk["ln1_g"], beta=blk["ln1_b"])   # (B*T, 3D) bf16
        qkv = qkv.reshape(B, T, 3, H, hd)                           # free view
        a = flash_attention(qkv, lengths,
                            tq=cfg.get("attn_block"), tkv=cfg.get("attn_block"))
        a = a.reshape(B * T, D)                                     # free view
        # attention output projection with the residual add fused in
        x = fused_matmul(a, blk["w_proj"], blk["b_proj"], residual=x)
        # LN2 fused into the FC matmul, GELU in the epilogue
        h = fused_matmul(x, blk["w_fc"], blk["b_fc"],
                         gamma=blk["ln2_g"], beta=blk["ln2_b"], act="gelu")
        x = fused_matmul(h, blk["w_out"], blk["b_out"], residual=x)

    # final LN + tied LM head + shifted CE, fused; logits never hit HBM
    return lm_head_ce(x, params["wte"], params["lnf_g"], params["lnf_b"],
                      labels.reshape(-1), loss_w.reshape(-1),
                      v_real=cfg["vocab"], tv=cfg.get("vocab_block"))


# ---------------------------------------------------------------------------
# Model.forward equivalent
# ---------------------------------------------------------------------------
def get_padded_tensor(sents, target, event_lens, weights, pad_token_id,
                      seq_align=8):
    sents = [list(s) for s in sents]
    target = [list(t) for t in target] if target is not None else None
    weights = [list(w) for w in weights] if weights is not None else None
    max_len = max(len(s) for s in sents)
    padded_len = _round_up(max_len, seq_align)      # tile/sublane alignment
    attention_mask = []
    for i in range(len(sents)):
        attention_mask.append([1] * len(sents[i]) + [0] * (padded_len - len(sents[i])))
        sents[i] = sents[i] + [pad_token_id] * (padded_len - len(sents[i]))
        if target is not None:
            target[i] = target[i] + [-100] * (padded_len - len(target[i]))
            target[i][:event_lens[i]] = [-100] * event_lens[i]
        if weights is not None:
            weights[i] = weights[i] + [1.0] * (padded_len - len(weights[i]))
    tokens = jnp.asarray(sents, jnp.int32)
    mask = jnp.asarray(attention_mask, jnp.int32)
    tgt = jnp.asarray(target, jnp.int32) if target is not None else None
    wts = jnp.asarray(weights, jnp.float32) if weights is not None else None
    return tokens, mask, tgt, wts, max_len


def model_forward(params, sents, target, event_lens, weights, cfg, pad_token_id=0):
    ids, attn_mask, tgt, wts, orig_max_len = get_padded_tensor(
        sents, target, event_lens, weights, pad_token_id,
        seq_align=cfg.get("seq_align", 8))
    B, T = ids.shape
    # Shifted labels/weights aligned with logit positions: position t predicts
    # token t+1; the last position gets label -100 (ignored) / weight 0.
    lab = jnp.concatenate([tgt[:, 1:], jnp.full((B, 1), -100, jnp.int32)], axis=1)
    if wts is not None:
        w = jnp.concatenate([wts[:, 1:], jnp.zeros((B, 1), jnp.float32)], axis=1)
    else:
        w = jnp.ones((B, T), jnp.float32)
    per_token = gpt2_forward_loss(params, ids, attn_mask, lab, w, cfg)  # (B*T,)
    # torch: CrossEntropyLoss(reduction='none') (ignored positions -> 0),
    # times weights, then .mean() over all B*(orig_max_len-1) shifted positions
    # (alignment-padded positions carry label -100 so they contribute 0).
    return jnp.sum(per_token) / (B * (orig_max_len - 1))


# ---------------------------------------------------------------------------
if __name__ == "__main__":
    cfg = dict(vocab=300, d_model=128, n_head=4, n_layer=2, max_pos=32, d_ff=512,
               # small blocks so this toy run exercises the multi-block online
               # softmax / online logsumexp accumulation paths, the causal
               # block-skip paths, and the padded-vocab masking path.
               attn_block=8, vocab_block=128, seq_align=8)
    key = jax.random.PRNGKey(0)
    pkey, tkey = jax.random.split(key)
    params = init_params(pkey, cfg)

    toks = jax.device_get(jax.random.randint(tkey, (2, 16), 1, cfg["vocab"]))
    sents = [list(map(int, toks[0, :12])), list(map(int, toks[1, :13]))]  # ragged 12, 13
    target = [list(s) for s in sents]                                     # LM targets = inputs
    event_lens = [2, 3]
    weights = [[1.0] * 12, [0.5] * 13]

    loss = model_forward(params, sents, target, event_lens, weights, cfg,
                         pad_token_id=0)
    jax.block_until_ready(loss)
    assert loss.shape == () and bool(jnp.isfinite(loss))
    print("KERNEL_OK")
</pallas_src>

<mosaic_0001>
module attributes {stable_mosaic.version = 11 : i64} {
  func.func @kernel(%arg0: i32, %arg1: i32, %arg2: memref<32x128xbf16, #tpu.memory_space<vmem>>, %arg3: memref<128x128xbf16, #tpu.memory_space<vmem>>, %arg4: memref<1x128xf32, #tpu.memory_space<vmem>>, %arg5: memref<1x128xf32, #tpu.memory_space<vmem>>, %arg6: memref<1x128xf32, #tpu.memory_space<vmem>>, %arg7: memref<32x128xbf16, #tpu.memory_space<vmem>>) attributes {dimension_semantics = [#tpu.dimension_semantics<parallel>, #tpu.dimension_semantics<parallel>], iteration_bounds = array<i64: 1, 3>, scalar_prefetch = 0 : i64, scratch_operands = 0 : i64, tpu.core_type = #tpu.core_type<tc>, window_params = [{transform_indices = @transform_0, window_bounds = array<i64: 32, 128>}, {transform_indices = @transform_1, window_bounds = array<i64: 128, 128>}, {transform_indices = @transform_2, window_bounds = array<i64: 1, 128>}, {pipeline_mode = #tpu.pipeline_mode<synchronous>, transform_indices = @transform_3, window_bounds = array<i64: 1, 128>}, {pipeline_mode = #tpu.pipeline_mode<synchronous>, transform_indices = @transform_4, window_bounds = array<i64: 1, 128>}, {transform_indices = @transform_5, window_bounds = array<i64: 32, 128>}]} {
    %c0 = arith.constant 0 : index
    %c0_0 = arith.constant 0 : index
    %0 = vector.load %arg2[%c0, %c0_0] : memref<32x128xbf16, #tpu.memory_space<vmem>>, vector<32x128xbf16>
    %1 = arith.extf %0 : vector<32x128xbf16> to vector<32x128xf32>
    %cst = arith.constant dense<0.000000e+00> : vector<32xf32>
    %2 = vector.multi_reduction <add>, %1, %cst [1] : vector<32x128xf32> to vector<32xf32>
    %3 = vector.shape_cast %2 : vector<32xf32> to vector<32x1xf32>
    %cst_1 = arith.constant 1.280000e+02 : f32
    %4 = vector.broadcast %cst_1 : f32 to vector<32x1xf32>
    %5 = arith.divf %3, %4 : vector<32x1xf32>
    %6 = vector.broadcast %5 : vector<32x1xf32> to vector<32x128xf32>
    %7 = arith.subf %1, %6 : vector<32x128xf32>
    %8 = arith.mulf %7, %7 : vector<32x128xf32>
    %cst_2 = arith.constant dense<0.000000e+00> : vector<32xf32>
    %9 = vector.multi_reduction <add>, %8, %cst_2 [1] : vector<32x128xf32> to vector<32xf32>
    %10 = vector.shape_cast %9 : vector<32xf32> to vector<32x1xf32>
    %cst_3 = arith.constant 1.280000e+02 : f32
    %11 = vector.broadcast %cst_3 : f32 to vector<32x1xf32>
    %12 = arith.divf %10, %11 : vector<32x1xf32>
    %13 = vector.broadcast %5 : vector<32x1xf32> to vector<32x128xf32>
    %14 = arith.subf %1, %13 : vector<32x128xf32>
    %cst_4 = arith.constant 9.99999974E-6 : f32
    %15 = vector.broadcast %cst_4 : f32 to vector<32x1xf32>
    %16 = arith.addf %12, %15 : vector<32x1xf32>
    %17 = math.rsqrt %16 : vector<32x1xf32>
    %18 = vector.broadcast %17 : vector<32x1xf32> to vector<32x128xf32>
    %19 = arith.mulf %14, %18 : vector<32x128xf32>
    %c0_5 = arith.constant 0 : index
    %c0_6 = arith.constant 0 : index
    %20 = vector.load %arg5[%c0_5, %c0_6] : memref<1x128xf32, #tpu.memory_space<vmem>>, vector<1x128xf32>
    %21 = vector.broadcast %20 : vector<1x128xf32> to vector<32x128xf32>
    %22 = arith.mulf %19, %21 : vector<32x128xf32>
    %c0_7 = arith.constant 0 : index
    %c0_8 = arith.constant 0 : index
    %23 = vector.load %arg6[%c0_7, %c0_8] : memref<1x128xf32, #tpu.memory_space<vmem>>, vector<1x128xf32>
    %24 = vector.broadcast %23 : vector<1x128xf32> to vector<32x128xf32>
    %25 = arith.addf %22, %24 : vector<32x128xf32>
    %26 = arith.truncf %25 : vector<32x128xf32> to vector<32x128xbf16>
    %c0_9 = arith.constant 0 : index
    %c0_10 = arith.constant 0 : index
    %27 = vector.load %arg3[%c0_9, %c0_10] : memref<128x128xbf16, #tpu.memory_space<vmem>>, vector<128x128xbf16>
    %cst_11 = arith.constant dense<0.000000e+00> : vector<32x128xf32>
    %28 = tpu.matmul %26, %27, %cst_11 {dimension_numbers = #tpu.dot_dimension_numbers<[1], [0], [0], [1], [0, 0, 1, 1], [], []>} : vector<32x128xbf16>, vector<128x128xbf16>, vector<32x128xf32> -> vector<32x128xf32>
    %c0_12 = arith.constant 0 : index
    %c0_13 = arith.constant 0 : index
    %29 = vector.load %arg4[%c0_12, %c0_13] : memref<1x128xf32, #tpu.memory_space<vmem>>, vector<1x128xf32>
    %30 = vector.broadcast %29 : vector<1x128xf32> to vector<32x128xf32>
    %31 = arith.addf %28, %30 : vector<32x128xf32>
    %32 = arith.truncf %31 : vector<32x128xf32> to vector<32x128xbf16>
    %c0_14 = arith.constant 0 : index
    %c0_15 = arith.constant 0 : index
    %33 = vector.load %arg7[%c0_14, %c0_15] : memref<32x128xbf16, #tpu.memory_space<vmem>>, vector<32x128xbf16>
    tpu.vector_store %arg7[%c0_14, %c0_15], %32 {strides = array<i32>} : memref<32x128xbf16, #tpu.memory_space<vmem>>, vector<32x128xbf16>,
    return
  }
  func.func @transform_0(%arg0: i32, %arg1: i32) -> (i32, i32) {
    %c0_i32 = arith.constant 0 : i32
    %c0_i32_0 = arith.constant 0 : i32
    return %arg0, %c0_i32 : i32, i32
  }
  func.func @transform_1(%arg0: i32, %arg1: i32) -> (i32, i32) {
    %c0_i32 = arith.constant 0 : i32
    %c0_i32_0 = arith.constant 0 : i32
    return %c0_i32, %arg1 : i32, i32
  }
  func.func @transform_2(%arg0: i32, %arg1: i32) -> (i32, i32) {
    %c0_i32 = arith.constant 0 : i32
    %c0_i32_0 = arith.constant 0 : i32
    return %c0_i32, %arg1 : i32, i32
  }
  func.func @transform_3(%arg0: i32, %arg1: i32) -> (i32, i32) {
    %c0_i32 = arith.constant 0 : i32
    %c0_i32_0 = arith.constant 0 : i32
    %c0_i32_1 = arith.constant 0 : i32
    return %c0_i32, %c0_i32_0 : i32, i32
  }
  func.func @transform_4(%arg0: i32, %arg1: i32) -> (i32, i32) {
    %c0_i32 = arith.constant 0 : i32
    %c0_i32_0 = arith.constant 0 : i32
    %c0_i32_1 = arith.constant 0 : i32
    return %c0_i32, %c0_i32_0 : i32, i32
  }
  func.func @transform_5(%arg0: i32, %arg1: i32) -> (i32, i32) {
    %c0_i32 = arith.constant 0 : i32
    return %arg0, %arg1 : i32, i32
  }
}

</mosaic_0001>

<bundles_post_ra>
// kernel: tpu_custom_call.1
= control target key start
LH: loop header
LB: loop body
LE: loop exit
PB: predicated region body
PF: predicated region fallthrough
CT: control target
= control target key end

     0   :  { %s1266_s0 = inlined_call_operand.hbm [shape: bf16[32,128], index: 0, kind: input, shape index: {}]   ;;  %s1267_s1 = inlined_call_operand.hbm [shape: bf16[128,384], index: 1, kind: input, shape index: {}]   ;;  %s1268_s2 = inlined_call_operand.hbm [shape: f32[1,384], index: 2, kind: input, shape index: {}]   ;;  %s1269_s3 = inlined_call_operand.vmem [shape: f32[1,128], index: 3, kind: input, shape index: {}]   ;;  %s1270_s4 = inlined_call_operand.vmem [shape: f32[1,128], index: 4, kind: input, shape index: {}]   ;;  %s1271_s5 = inlined_call_operand.hbm [shape: bf16[32,384], index: 5, kind: output, shape index: {}]  }
   0x1   :  { %1274 = sst [smem:[#allocation12_spill]] %s1266_s0 }
   0x2   :  { %1275 = sst [smem:[#allocation13_spill]] %s1267_s1 }
   0x3   :  { %10 = vsyncpa [#allocation3], 0 }
   0x4   :  { %11 = vsyncpa [#allocation6], 0 }
   0x5   :  { %13 = vsyncpa [#allocation6 + $0x1], 0 }
   0x6   :  { %14 = vsyncpa [#allocation4], 0 }
   0x7   :  { %16 = vsyncpa [#allocation4 + $0x1], 0  ;;  %s1053_s18 = smov 0   ;;  %s1055_s19 = smov 0  }
   0x8   :  { %s1057_s20 = smov 0   ;;  %s1059_s21 = smov 0  }
   0x9   :  { %s1061_s22 = smov 0   ;;  %s1063_s23 = smov 0  }
   0xa LB: > { %s31_s24 = sadd.s32 1, %s1009_s22  ;;  %s67_s25 = sadd.s32 1, %s1001_s20  ;;  %s1013_s23 = sphi %s1063_s23, %s22_s23   ;;  %s1009_s22 = sphi %s1061_s22, %s1290_s22   ;;  %s1005_s21 = sphi %s1059_s21, %s1289_s21   ;;  %s1001_s20 = sphi %s1057_s20, %s1288_s20   ;;  %s997_s19 = sphi %s1055_s19, %s1287_s19   ;;  %s993_s18 = sphi %s1053_s18, %s1286_s18  }
   0xb   : > { %p32_p0 = scmp.ge.s32.totalorder %s31_s24, 3  ;;  %p74_p1 = scmp.ne.s32.totalorder %s1001_s20, %s997_s19 }
   0xc   : > { %p75_p2 = scmp.eq.s32.totalorder %s1013_s23, 0  ;;  %p765_p5 = scmp.lt.s32.totalorder %s1013_s23, 3 }
   0xd   : > { %s1292_s24 = smov (%p32_p0, %s31_s24), 0  ;;  %s223_s28 = sand.u32 1, %s1013_s23  }
   0xe   : > { %p1093_p3 = por %p75_p2, %p74_p1  ;;  %s64_s27 = ssub.s32 %s1009_s22, %s1292_s24 }
   0xf   : > { %p65_p4 = scmp.eq.s32.totalorder %s64_s27, 0  ;;  %s225_s29 = sand.u32 1, %s1001_s20  }
  0x10   : > { %s661_s6 = sshll.u32 %s225_s29, 6  ;;  %s662_s7 = sshll.u32 %s1009_s22, 2 }
  0x11   : > { %s1103_s30 = scalar_select %p65_p4, %s1001_s20, %s67_s25  }
  0x12   : > { %s1277_s1 = sld [smem:[#allocation13_spill]]  ;;  %s227_s11 = scalar_lea.vmem [#allocation5], %s661_s6 }
  0x13   : > { %s234_s12 = sshll.u32 %s227_s11, 4  ;;  %p1113_p6 = pnand %p765_p5, %p1093_p3  ;;  %s235_s12 = int_to_ptr.vmem [resolvable:$true] %s234_s12 }
  0x14   : > { %s1117_s15 = scalar_lea.sflag [#allocation6], %s223_s28  ;;  %s1015_s16 = smov 192  }
  0x15   : > { %s1272_s17 = smov 64   ;;  %s1273_s25 = smov 4  }
  0x16   : > { %s1125_s27 = sadd.s32 4294967295, %s1013_s23   ;;  %s657_s26 = sadd.s32 4294967294, %s1013_s23  }
  0x17   : > { %p80_p7 = scmp.ne.s32.totalorder %s997_s19, %s993_s18  ;;  %p81_p8 = scmp.eq.s32.totalorder %s1125_s27, 0 }
  0x18   : > { %s231_s10 = scalar_lea.hbm %s1277_s1, %s662_s7  ;;  %p174_p9 = scmp.eq.s32.totalorder %s1125_s27, 2 }
  0x19   : > { %s232_s13 = sshll.u32 %s231_s10, 4  ;;  %p180_p10 = scmp.eq.s32.totalorder %s657_s26, 2  ;;  %s233_s13 = int_to_ptr.hbm [resolvable:$true] %s232_s13 }
  0x1a   : > { %756 = dma.hbm_to_vmem [thread:$0]  (!%p1113_p6), %s233_s13, 1024, %s235_s12, %s1117_s15, %s1015_s16, %s1272_s17, %s1273_s25  }
  0x1b   : > { %p1134_p11 = por %p81_p8, %p80_p7  ;;  %p658_p12 = scmp.ge.s32.totalorder %s1013_s23, 1 }
  0x1c   : > { %p1142_p13 = por %p174_p9, %p74_p1  ;;  %p1146_p0 = por %p180_p10, %p80_p7 }
  0x1d   : > { %p187_p2 = scmp.lt.s32.totalorder %s1013_s23, 4  ;;  %s1282_s0 = sld [smem:[#allocation12_spill]] }
  0x1e   : > { %s1018_s12 = smov [#allocation2]   ;;  %s250_s17 = scalar_lea.hbm %s1268_s2, %s1009_s22 }
  0x1f   : > { %p1154_p3 = pnand %p658_p12, %p187_p2  ;;  %s203_s13 = sshll.u32 %s1018_s12, 4  ;;  %s204_s13 = int_to_ptr.vmem [resolvable:$true] %s203_s13 }
  0x20   : > { %s247_s8 = scalar_lea.vmem [#allocation7], %s225_s29  ;;  %s252_s25 = sshll.u32 %s250_s17, 4  ;;  %s253_s25 = int_to_ptr.hbm [resolvable:$true] %s252_s25 }
  0x21   : > { %p749_p1 = pneg %p1154_p3  ;;  %s254_s9 = sshll.u32 %s247_s8, 4  ;;  %s255_s9 = int_to_ptr.vmem [resolvable:$true] %s254_s9 }
  0x22   : > { %s1285_s1 = smov 64   ;;  %263 = sbr.rel (%p1154_p3) target bundleno = 467 (0x1d3), region = 40 }
  0x23   : > { %s201_s10 = sshll.u32 %s1282_s0, 4  ;;  %p750_p4 = pnand %p749_p1, %p81_p8  ;;  %s202_s10 = int_to_ptr.hbm [resolvable:$true] %s201_s10 }
  0x24   : > { %s1284_s0 = smov 4  }
  0x25   : > { %752 = dma.hbm_to_vmem [thread:$0]  (!%p750_p4), %s202_s10, 256, %s204_s13, [#allocation3], %s1285_s1, %s1285_s1, %s1284_s0  }
  0x26   : > { %759 = dma.hbm_to_vmem [thread:$0]  (!%p1113_p6), %s253_s25, 16, %s255_s9, %s1117_s15  }
  0x27   : > { %980 = dma.done.wait (%p81_p8), [#allocation3], 256  }
  0x28   : > { %982 = vsyncadd (%p81_p8), [#allocation3], 4294967040  ;;  %s270_s29 = sand.u32 1, %s1125_s27   ;;  %s1182_s17 = sand.u32 1, %s997_s19  }
  0x29   : > { %s665_s12 = sshll.u32 %s1182_s17, 6  ;;  %s271_s0 = scalar_lea.sflag [#allocation6], %s270_s29 }
  0x2a   : > { %s1185_s1 = scalar_lea.vmem [#allocation5], %s665_s12 }
  0x2b   : > { %984 = dma.done.wait (%p1134_p11), %s271_s0, 1040  }
  0x2c   : > { %986 = vsyncadd (%p1134_p11), %s271_s0, 4294966256  ;;  %v729_v0 = vld [vmem:[#allocation2 + $0x8] sm:$0xff]   ;;  %v712_v1 = vld [vmem:[#allocation2] sm:$0xff]   ;;  %v1019_v6 = vmov 128.0   ;;  %s283_s14 = scalar_lea.vmem [#allocation7], %s1182_s17  ;;  %s666_s10 = sshll.u32 %s1182_s17, 4 }
  0x2d   : > { %v717_v2 = vunpack.c.l.bf16 %v729_v0  ;;  %v713_v3 = vunpack.c.l.bf16 %v712_v1  ;;  %v718_v4 = vunpack.c.h.bf16 %v729_v0  ;;  %v714_v5 = vunpack.c.h.bf16 %v712_v1  ;;  %v710_v29 = vld [vmem:[%s1185_s1 + $0x38] sm:$0xff]  ;;  %v709_v30 = vld [vmem:[%s1185_s1 + $0x30] sm:$0xff]  ;;  %v708_v31 = vld [vmem:[%s1185_s1 + $0x28] sm:$0xff]  ;;  %s700_s11 = sshll.u32 %s1005_s21, 2  ;;  %s314_s8 = scalar_lea.vmem [#allocation8], %s666_s10 }
  0x2e   : > { %827 = vrcp.f32 %v1019_v6  ;;  %498 = vmatpush.bf16.msra.mxu0 %v710_v29  ;;  %731 = vmatpush.bf16.msra.mxu1 %v710_v29  ;;  %v707_v32 = vld [vmem:[%s1185_s1 + $0x20] sm:$0xff]  ;;  %v706_v33 = vld [vmem:[%s1185_s1 + $0x18] sm:$0xff]  ;;  %v705_v34 = vld [vmem:[%s1185_s1 + $0x10] sm:$0xff]  ;;  %s539_s26 = scalar_lea.hbm %s1271_s5, %s700_s11  ;;  %s540_s9 = sshll.u32 %s314_s8, 4  ;;  %s541_s9 = int_to_ptr.vmem [resolvable:$true] %s540_s9 }
  0x2f   : > { %329 = vadd.xlane.f32.xlu1 %v717_v2  ;;  %325 = vadd.xlane.f32.xlu0 %v713_v3  ;;  %v704_v35 = vld [vmem:[%s1185_s1 + $0x8] sm:$0xff]  ;;  %v703_v40 = vld [vmem:[%s1185_s1] sm:$0xff]  ;;  %s542_s29 = sshll.u32 %s539_s26, 4  ;;  %s526_s21 = scalar_lea.sflag [#allocation4], %s1182_s17  ;;  %s543_s29 = int_to_ptr.hbm [resolvable:$true] %s542_s29 }
  0x30   : > { %s941_s12 = sshra.s32 %s543_s29, 4  ;;  %s947_s15 = scalar_lea.hbm %s1271_s5, 48  ;;  %s942_s12 = int_to_ptr.hbm [resolvable:$true] %s941_s12 }
  0x31   : > { %s943_s0 = scalar_lea.hbm %s942_s12, 16  ;;  %p948_p8 = scmp.lt.s32.totalorder %s942_s12, %s1271_s5 }
  0x32   : > { %499 = vmatpush.bf16.msra.mxu0 %v709_v30  ;;  %732 = vmatpush.bf16.msra.mxu1 %v709_v30  ;;  %p944_p5 = scmp.ne.s32.totalorder %s942_s12, %s943_s0  ;;  %p949_p9 = scmp.lt.s32.totalorder %s947_s15, %s943_s0 }
  0x34   : > { %v828_v7 = vpop.eup %827  ;;  %p945_p6 = pnand %p944_p5, %p1142_p13  ;;  %p950_p10 = por %p949_p9, %p948_p8 }
  0x35   : > { %v334_v8 = vmul.f32 128.0, %v828_v7  ;;  %vm338_vm0 = vweird.f32 %v828_v7 }
  0x36   : > { %500 = vmatpush.bf16.msra.mxu0 %v708_v31  ;;  %733 = vmatpush.bf16.msra.mxu1 %v708_v31  ;;  %p946_p7 = pneg %p945_p6 }
  0x37   : > { %331 = vadd.xlane.f32.xlu1 %v718_v4  ;;  %327 = vadd.xlane.f32.xlu0 %v714_v5  ;;  %v335_v9 = vsub.f32 1.0, %v334_v8 }
  0x38   : > { %p951_p11 = pnand %p950_p10, %p946_p7 }
  0x39   : > { %v336_v10 = vmul.f32 %v828_v7, %v335_v9  ;;  %v824_v9 = vld [vmem:[%s1269_s3] ss:$0 sm:$0xff] }
  0x3a   : > { %501 = vmatpush.bf16.msra.mxu0 %v707_v32  ;;  %734 = vmatpush.bf16.msra.mxu1 %v707_v32 }
  0x3b   : > { %v337_v11 = vadd.f32 %v828_v7, %v336_v10 }
  0x3d   : > { %v339_v12 = vsel %vm338_vm0, %v828_v7, %v337_v11 }
  0x3e   : > { %502 = vmatpush.bf16.msra.mxu0 %v706_v33  ;;  %735 = vmatpush.bf16.msra.mxu1 %v706_v33 }
  0x42   : > { %503 = vmatpush.bf16.msra.mxu0 %v705_v34  ;;  %736 = vmatpush.bf16.msra.mxu1 %v705_v34 }
  0x46   : > { %504 = vmatpush.bf16.msra.mxu0 %v704_v35  ;;  %737 = vmatpush.bf16.msra.mxu1 %v704_v35 }
  0x4a   : > { %505 = vmatpush.bf16.msra.mxu0 %v703_v40  ;;  %738 = vmatpush.bf16.msra.mxu1 %v703_v40 }
  0xa2   : > { %v330_v13 = vpop.xlane.xlu1 %329  ;;  %v326_v14 = vpop.xlane.xlu0 %325 }
  0xa3   : > { %v342_v15 = vmul.f32 %v339_v12, %v330_v13  ;;  %v340_v16 = vmul.f32 %v339_v12, %v326_v14 }
  0xa5   : > { %v1191_v17 = vsub.f32 %v717_v2, %v342_v15  ;;  %v1193_v18 = vsub.f32 %v713_v3, %v340_v16  ;;  %v825_v16 = vld [vmem:[%s1270_s4] ss:$0 sm:$0xff] }
  0xa7   : > { %v350_v19 = vmul.f32 %v1191_v17, %v1191_v17  ;;  %v348_v20 = vmul.f32 %v1193_v18, %v1193_v18 }
  0xa9   : > { %356 = vadd.xlane.f32.xlu0 %v350_v19  ;;  %352 = vadd.xlane.f32.xlu2 %v348_v20 }
  0xaa   : > { %v332_v21 = vpop.xlane.xlu1 %331  ;;  %v328_v22 = vpop.xlane.xlu0 %327 }
  0xab   : > { %v343_v23 = vmul.f32 %v339_v12, %v332_v21  ;;  %v341_v24 = vmul.f32 %v339_v12, %v328_v22 }
  0xad   : > { %v1199_v25 = vsub.f32 %v718_v4, %v343_v23  ;;  %v1201_v26 = vsub.f32 %v714_v5, %v341_v24 }
  0xaf   : > { %v351_v27 = vmul.f32 %v1199_v25, %v1199_v25  ;;  %v349_v28 = vmul.f32 %v1201_v26, %v1201_v26 }
  0xb1   : > { %358 = vadd.xlane.f32.xlu1 %v351_v27  ;;  %354 = vadd.xlane.f32.xlu2 %v349_v28 }
 0x11c   : > { %v353_v36 = vpop.xlane.xlu2 %352  ;;  %v357_v37 = vpop.xlane.xlu0 %356 }
 0x11d   : > { %v360_v38 = vmul.f32 %v353_v36, %v339_v12  ;;  %v362_v39 = vmul.f32 %v357_v37, %v339_v12 }
 0x11f   : > { %v364_v41 = vadd.f32 1e-05, %v360_v38  ;;  %v366_v42 = vadd.f32 1e-05, %v362_v39 }
 0x121   : > { %829 = vrsqrt.f32 %v364_v41  ;;  %vm394_vm3 = vweird.f32 %v366_v42  ;;  %vm374_vm4 = vweird.f32 %v364_v41 }
 0x122   : > { %831 = vrsqrt.f32 %v366_v42 }
 0x124   : > { %v359_v43 = vpop.xlane.xlu1 %358  ;;  %v355_v44 = vpop.xlane.xlu2 %354 }
 0x125   : > { %v363_v45 = vmul.f32 %v359_v43, %v339_v12  ;;  %v361_v46 = vmul.f32 %v355_v44, %v339_v12 }
 0x127   : > { %v830_v47 = vpop.eup %829  ;;  %v367_v48 = vadd.f32 1e-05, %v363_v45  ;;  %v365_v49 = vadd.f32 1e-05, %v361_v46 }
 0x128   : > { %v832_v50 = vpop.eup %831  ;;  %v369_v51 = vmul.f32 %v830_v47, %v364_v41  ;;  %vm375_vm2 = vweird.f32 %v830_v47 }
 0x129   : > { %v389_v52 = vmul.f32 %v832_v50, %v366_v42  ;;  %833 = vrsqrt.f32 %v367_v48  ;;  %vm395_vm1 = vweird.f32 %v832_v50  ;;  %vm376_vm6 = vmor %vm374_vm4, %vm375_vm2  ;;  %vm404_vm9 = vweird.f32 %v367_v48 }
 0x12a   : > { %v370_v53 = vmul.f32 %v830_v47, %v369_v51  ;;  %835 = vrsqrt.f32 %v365_v49  ;;  %vm396_vm5 = vmor %vm394_vm3, %vm395_vm1  ;;  %vm384_vm11 = vweird.f32 %v365_v49 }
 0x12b   : > { %v390_v54 = vmul.f32 %v832_v50, %v389_v52 }
 0x12c   : > { %v371_v55 = vmul.f32 0.5, %v370_v53 }
 0x12d   : > { %v391_v56 = vmul.f32 0.5, %v390_v54 }
 0x12e   : > { %v372_v57 = vsub.f32 1.5, %v371_v55 }
 0x12f   : > { %v834_v58 = vpop.eup %833  ;;  %v392_v59 = vsub.f32 1.5, %v391_v56 }
 0x130   : > { %v836_v60 = vpop.eup %835  ;;  %v399_v61 = vmul.f32 %v834_v58, %v367_v48  ;;  %v373_v62 = vmul.f32 %v830_v47, %v372_v57  ;;  %vm405_vm7 = vweird.f32 %v834_v58 }
 0x131   : > { %v393_v63 = vmul.f32 %v832_v50, %v392_v59  ;;  %v379_v0 = vmul.f32 %v836_v60, %v365_v49  ;;  %vm385_vm8 = vweird.f32 %v836_v60  ;;  %vm406_vm10 = vmor %vm404_vm9, %vm405_vm7 }
 0x132   : > { %v400_v1 = vmul.f32 %v834_v58, %v399_v61  ;;  %v377_v6 = vsel %vm376_vm6, %v830_v47, %v373_v62  ;;  %vm386_vm12 = vmor %vm384_vm11, %vm385_vm8 }
 0x133   : > { %v380_v2 = vmul.f32 %v836_v60, %v379_v0  ;;  %v397_v4 = vsel %vm396_vm5, %v832_v50, %v393_v63  ;;  %v408_v12 = vmul.f32 %v377_v6, %v1193_v18 }
 0x134   : > { %v401_v3 = vmul.f32 0.5, %v400_v1  ;;  %v410_v10 = vmul.f32 %v397_v4, %v1191_v17 }
 0x135   : > { %v381_v5 = vmul.f32 0.5, %v380_v2  ;;  %v416_v21 = vmul.f32 %v824_v9, %v408_v12 }
 0x136   : > { %v402_v7 = vsub.f32 1.5, %v401_v3  ;;  %v418_v20 = vmul.f32 %v824_v9, %v410_v10 }
 0x137   : > { %v382_v8 = vsub.f32 1.5, %v381_v5  ;;  %v424_v27 = vadd.f32 %v825_v16, %v416_v21 }
 0x138   : > { %v403_v11 = vmul.f32 %v834_v58, %v402_v7  ;;  %v426_v23 = vadd.f32 %v825_v16, %v418_v20 }
 0x139   : > { %v383_v13 = vmul.f32 %v836_v60, %v382_v8 }
 0x13a   : > { %v407_v14 = vsel %vm406_vm10, %v834_v58, %v403_v11 }
 0x13b   : > { %v387_v15 = vsel %vm386_vm12, %v836_v60, %v383_v13  ;;  %v411_v19 = vmul.f32 %v407_v14, %v1199_v25  ;;  %v826_v25 = vld [vmem:[%s283_s14] ss:$0 sm:$0xff] }
 0x13c   : > { %v409_v17 = vmul.f32 %v387_v15, %v1201_v26 }
 0x13d   : > { %v419_v18 = vmul.f32 %v824_v9, %v411_v19 }
 0x13e   : > { %v417_v22 = vmul.f32 %v824_v9, %v409_v17 }
 0x13f   : > { %v427_v24 = vadd.f32 %v825_v16, %v419_v18 }
 0x140   : > { %v425_v28 = vadd.f32 %v825_v16, %v417_v22 }
 0x141   : > { %v429_v29 = vpack.c.bf16 %v427_v24, %v426_v23 }
 0x142   : > { %v428_v30 = vpack.c.bf16 %v425_v28, %v424_v27 }
 0x143   : > { %511 = vmatmul.bf16.vlgmr.msra.gmra.mxu1 %v429_v29 }
 0x144   : > { %506 = vmatmul.bf16.vlgmr.msra.gmra.mxu0 %v428_v30 }
 0x1c0   : > { %v512_v31 = vpop.f32.mrf.mxu1 }
 0x1c1   : > { %v507_v32 = vpop.f32.mrf.mxu0  ;;  %v513_v33 = vadd.f32 %v826_v25, %v512_v31 }
 0x1c2   : > { %v508_v36 = vadd.f32 %v826_v25, %v507_v32 }
 0x1c8   : > { %v514_v26 = vpop.f32.mrf.mxu1 }
 0x1c9   : > { %v509_v34 = vpop.f32.mrf.mxu0  ;;  %v515_v35 = vadd.f32 %v826_v25, %v514_v26 }
 0x1ca   : > { %v510_v37 = vadd.f32 %v826_v25, %v509_v34 }
 0x1cb   : > { %v727_v38 = vpack.c.bf16 %v515_v35, %v513_v33 }
 0x1cc   : > { %v722_v39 = vpack.c.bf16 %v510_v37, %v508_v36 }
 0x1cd   : > { %730 = vst [vmem:[%s314_s8 + $0x8] sm:$0xff] %v727_v38  }
 0x1ce   : > { %723 = vst [vmem:[%s314_s8] sm:$0xff] %v722_v39  }
 0x1cf   : > { %954 = shalt.err (!%p951_p11)
}
 0x1d0   : > { %s1020_s17 = smov 64   ;;  %s1021_s28 = smov 192  }
 0x1d1   : > { %s1022_s10 = smov 4  }
 0x1d2   : > { %747 = dma.vmem_to_hbm [thread:$0]  (%p1142_p13), %s541_s9, 256, %s543_s29, %s526_s21, %s1020_s17, %s1021_s28, %s1022_s10  }
 0x1d3 PF: > { %p767_p12 = scmp.ge.s32.totalorder %s1013_s23, 2  ;;  %s557_s11 = sand.u32 1, %s993_s18  }
 0x1d4   : > { %s558_s13 = scalar_lea.sflag [#allocation4], %s557_s11 }
 0x1d5   : > { %p761_p2 = pnand %p767_p12, %p1146_p0 }
 0x1d7   : > { %p762_p3 = pneg %p761_p2 }
 0x1d9   : > { %988 = dma.done.wait (%p762_p3), %s558_s13, 256  }
 0x1da   : > { %990 = vsyncadd (%p762_p3), %s558_s13, 4294967040  ;;  %s22_s23 = sadd.s32 1, %s1013_s23   ;;  %s1286_s18 = smov %s997_s19 }
 0x1db   : > { %p19_p1 = scmp.ge.s32.totalorder %s22_s23, 5   ;;  %s1287_s19 = smov %s1001_s20 }
 0x1dc   : > { %s1288_s20 = smov %s1103_s30  ;;  %s1289_s21 = smov %s1009_s22 }
 0x1dd   : > { %s1290_s22 = smov %s1292_s24  ;;  %21 = sbr.rel (!%p19_p1) target bundleno = 10 (0xa), region = 102 }
 0x1e2   :  { %564 = vsyncpa [#allocation3], 1 }
 0x1e3   :  { %566 = vsyncpa [#allocation3 + $0x1], 1 }
 0x1e4   :  { %567 = vsyncpa [#allocation6], 1 }
 0x1e5   :  { %569 = vsyncpa [#allocation6 + $0x1], 1 }
 0x1e6   :  { %570 = vsyncpa [#allocation4], 1 }
 0x1e7   :  { %572 = vsyncpa [#allocation4 + $0x1], 1 }

</bundles_post_ra>
